<compile_context>
chip_gen: v6e
topology: v6e:2x2x1
jax: 0.10.0
libtpu: 0.0.40
codegen_flags: <defaults>
</compile_context>

<pallas_src>
import jax
import jax.numpy as jnp
from jax import lax
from jax.experimental import pallas as pl
from jax.experimental.pallas import tpu as pltpu

POOL = 4            # nn.MaxPool2d(kernel_size=4, stride=4)
COS_EPS = 1e-8      # F.cosine_similarity eps (clamped per-norm, like torch)
MAX_TILE_N = 4096   # lane tile over pooled positions; safe on v5e/v6e/v7x VMEM


def _round_up(x, m):
    return ((x + m - 1) // m) * m


def _stats_kernel(gt_ref, pred_ref, mask_ref, fea_ref,
                  pos_sum_ref, pos_cnt_ref, neg_cnt_ref, negw_ref):
    """Per (batch, chunk, N-tile): indicators, masked positive feature sum (MXU),
    pos/neg counts, and the negative-masked inverse feature norm."""
    t = pl.program_id(2)

    @pl.when(t == 0)
    def _():
        pos_sum_ref[...] = jnp.zeros_like(pos_sum_ref)
        pos_cnt_ref[...] = jnp.zeros_like(pos_cnt_ref)
        neg_cnt_ref[...] = jnp.zeros_like(neg_cnt_ref)

    gt = gt_ref[0]        # (1, TILE_N) -- already max-pooled
    pred = pred_ref[0]    # (1, TILE_N)
    mask = mask_ref[0]    # (1, TILE_N)

    positive = gt * mask
    neg_pred = (1.0 - gt) * mask * pred
    pos_ind = (positive == 1.0).astype(jnp.float32)   # (1, TILE_N)
    neg_ind = (neg_pred >= 0.2).astype(jnp.float32)   # (1, TILE_N)

    fea = fea_ref[0]                                   # (C, TILE_N), native dtype

    # MXU: pos_ind (1, TILE_N) contracted against fea (C, TILE_N) -> (1, C).
    pos_sum_ref[0] += lax.dot_general(
        pos_ind.astype(fea.dtype), fea,
        dimension_numbers=(((1,), (1,)), ((), ())),
        preferred_element_type=jnp.float32)

    pos_cnt_ref[0] += jnp.sum(pos_ind, axis=-1, keepdims=True)   # (1, 1)
    neg_cnt_ref[0] += jnp.sum(neg_ind, axis=-1, keepdims=True)   # (1, 1)

    # Per-position 1/max(||fea||, eps), pre-masked by the negative indicator.
    # (Upcast to f32 in-register: v5e VPU has no bf16 arithmetic.)
    fea_f = fea.astype(jnp.float32)
    f_sq = jnp.sum(fea_f * fea_f, axis=0, keepdims=True)          # (1, TILE_N)
    inv_f = lax.rsqrt(jnp.maximum(f_sq, COS_EPS * COS_EPS))
    negw_ref[0] = neg_ind * inv_f


def _negloss_kernel(q_ref, fea_ref, negw_ref, loss_ref):
    """Per (batch, chunk, N-tile): sigmoid(10*cos(q_gt, fea)) summed over the
    negative set. cos uses the precomputed masked inverse norm; q is already
    unit-normalized, dots go through the MXU."""
    t = pl.program_id(2)

    @pl.when(t == 0)
    def _():
        loss_ref[...] = jnp.zeros_like(loss_ref)

    q = q_ref[...]        # (1, C), unit-normalized, fea dtype
    fea = fea_ref[0]      # (C, TILE_N)
    negw = negw_ref[0]    # (1, TILE_N): neg_ind / max(||fea||, eps)

    dots = lax.dot_general(q, fea,
                           dimension_numbers=(((1,), (0,)), ((), ())),
                           preferred_element_type=jnp.float32)    # (1, TILE_N)
    cos = dots * negw                        # true cosine at negatives, 0 elsewhere
    sig = 0.5 * (1.0 + jnp.tanh(5.0 * cos))  # == sigmoid(10*cos), single EUP op
    contrib = jnp.where(negw > 0.0, sig, 0.0)
    loss_ref[0] += jnp.sum(contrib, axis=-1, keepdims=True)       # (1, 1)


def contrast_loss(fea_middle, pred, gt, mask, max_tile_n=MAX_TILE_N):
    B, C, H4, W4 = fea_middle.shape
    H, W = gt.shape[-2:]
    assert H == H4 * POOL and W == W4 * POOL
    N = H4 * W4

    pred = pred.astype(jnp.float32)
    gt = gt.astype(jnp.float32)
    mask = mask.astype(jnp.float32)
    # fea keeps its caller dtype (bf16 streams bf16 straight into the MXU).

    def pool(x):  # (B, H, W) -> (B, 1, N): MaxPool2d(4, 4) hoisted to XLA.
        xp = jnp.max(x.reshape(B, H4, POOL, W4, POOL), axis=(2, 4))
        return xp.reshape(B, 1, N)

    gt_p = pool(gt[:, 0])
    pred_p = pool(pred[:, 0])
    mask_p = pool(mask)
    fea = fea_middle.reshape(B, C, N)   # native layout, trailing-dim flatten only

    # Tiling: tile is a multiple of 128; pad N so every grid step sees a full
    # tile (padded mask is 0 -> padded positions contribute nothing).
    tile_n = min(max_tile_n, _round_up(N, 128))
    nt_total = pl.cdiv(N, tile_n)
    nc = 2 if (B == 1 and nt_total >= 2) else 1   # keep both v7x TCs busy at B==1
    nt = pl.cdiv(nt_total, nc)
    n_pad = nc * nt * tile_n
    if n_pad != N:
        padw = ((0, 0), (0, 0), (0, n_pad - N))
        gt_p = jnp.pad(gt_p, padw)
        pred_p = jnp.pad(pred_p, padw)
        mask_p = jnp.pad(mask_p, padw)
        fea = jnp.pad(fea, padw)

    bb = B * nc
    grid = (B, nc, nt)

    map_spec = pl.BlockSpec((1, 1, tile_n), lambda b, c, t: (b, 0, c * nt + t))
    fea_spec = pl.BlockSpec((1, C, tile_n), lambda b, c, t: (b, 0, c * nt + t))
    acc_c_spec = pl.BlockSpec((1, 1, C), lambda b, c, t: (b * nc + c, 0, 0))
    acc_1_spec = pl.BlockSpec((1, 1, 1), lambda b, c, t: (b * nc + c, 0, 0))

    pos_sum, pos_cnt, neg_cnt, negw = pl.pallas_call(
        _stats_kernel,
        out_shape=(
            jax.ShapeDtypeStruct((bb, 1, C), jnp.float32),      # masked feature sum
            jax.ShapeDtypeStruct((bb, 1, 1), jnp.float32),      # positive count
            jax.ShapeDtypeStruct((bb, 1, 1), jnp.float32),      # negative count
            jax.ShapeDtypeStruct((B, 1, n_pad), jnp.float32),   # neg_ind * 1/||fea||
        ),
        grid_spec=pltpu.PrefetchScalarGridSpec(
            num_scalar_prefetch=0,
            grid=grid,
            in_specs=[map_spec, map_spec, map_spec, fea_spec],
            out_specs=(acc_c_spec, acc_1_spec, acc_1_spec, map_spec),
        ),
        compiler_params=pltpu.CompilerParams(
            dimension_semantics=("parallel", "parallel", "arbitrary")),
    )(gt_p, pred_p, mask_p, fea)

    pos_cnt_tot = jnp.sum(pos_cnt)
    neg_cnt_tot = jnp.sum(neg_cnt)
    # q_gt = torch.mean(fea[positive == 1], dim=0); NaN when there are no
    # positives, matching the PyTorch module's behaviour.
    q = jnp.sum(pos_sum, axis=0) / pos_cnt_tot                     # (1, C)
    # F.cosine_similarity clamps each norm separately; fold the q-side clamp in.
    q_norm = jnp.sqrt(jnp.sum(q * q))
    q_unit = (q / jnp.maximum(q_norm, COS_EPS)).astype(fea.dtype)  # (1, C)

    loss_b = pl.pallas_call(
        _negloss_kernel,
        out_shape=jax.ShapeDtypeStruct((bb, 1, 1), jnp.float32),
        grid_spec=pltpu.PrefetchScalarGridSpec(
            num_scalar_prefetch=0,
            grid=grid,
            in_specs=[
                pl.BlockSpec((1, C), lambda b, c, t: (0, 0)),   # q broadcast
                fea_spec,
                map_spec,
            ],
            out_specs=acc_1_spec,
        ),
        compiler_params=pltpu.CompilerParams(
            dimension_semantics=("parallel", "parallel", "arbitrary")),
    )(q_unit, fea, negw)

    # negloss: sigmoid(10*cos).sum() / num_neg ; 0 if the negative set is empty.
    loss_sum = jnp.sum(loss_b)
    return jnp.where(neg_cnt_tot > 0, loss_sum / neg_cnt_tot, jnp.float32(0.0))


def _reference_loss(fea_middle, pred, gt, mask):
    """Plain-JAX reference mirroring the PyTorch forward (per-norm eps clamp,
    exact elementwise dot products)."""
    fea32 = fea_middle.astype(jnp.float32)
    B, C, H4, W4 = fea32.shape

    def pool(x):  # (B, H, W) -> (B, H/4, W/4)
        return jnp.max(x.reshape(B, H4, POOL, W4, POOL), axis=(2, 4))

    gt_p = pool(gt[:, 0].astype(jnp.float32))
    pred_p = pool(pred[:, 0].astype(jnp.float32))
    mask_p = pool(mask.astype(jnp.float32))
    positive = gt_p * mask_p
    neg_pred = (1.0 - gt_p) * mask_p * pred_p

    fea = jnp.transpose(fea32, (0, 2, 3, 1)).reshape(-1, C)
    pos_ind = (positive == 1.0).astype(jnp.float32).reshape(-1)
    neg_ind = (neg_pred >= 0.2).astype(jnp.float32).reshape(-1)

    q = jnp.sum(fea * pos_ind[:, None], axis=0) / jnp.sum(pos_ind)
    q_norm = jnp.sqrt(jnp.sum(q * q))
    f_norm = jnp.sqrt(jnp.sum(fea * fea, axis=1))
    dots = jnp.sum(fea * q[None, :], axis=1)
    cos = dots / (jnp.maximum(f_norm, COS_EPS) * jnp.maximum(q_norm, COS_EPS))
    sig = 1.0 / (1.0 + jnp.exp(-10.0 * cos))
    ncnt = jnp.sum(neg_ind)
    return jnp.where(ncnt > 0, jnp.sum(sig * neg_ind) / ncnt, 0.0)


if __name__ == "__main__":
    B, C, H, W = 2, 32, 16, 16
    H4, W4 = H // POOL, W // POOL

    key = jax.random.PRNGKey(0)
    k1, k2, k3 = jax.random.split(key, 3)

    fea_middle = jax.random.normal(k1, (B, C, H4, W4), dtype=jnp.float32)
    gt = (jax.random.uniform(k2, (B, 1, H, W)) > 0.9).astype(jnp.float32)
    pred = jax.random.uniform(k3, (B, 1, H, W), dtype=jnp.float32)
    mask = jnp.ones((B, H, W), dtype=jnp.float32)

    # Guarantee at least one positive pooled cell and one confident negative cell.
    gt = gt.at[0, 0, 0, 0].set(1.0)
    gt = gt.at[:, 0, 8:12, 8:12].set(0.0)
    pred = pred.at[:, 0, 8:12, 8:12].set(0.9)

    loss = jax.block_until_ready(jax.jit(contrast_loss)(fea_middle, pred, gt, mask))
    ref = jax.block_until_ready(_reference_loss(fea_middle, pred, gt, mask))
    assert bool(jnp.isfinite(loss)), loss
    assert jnp.allclose(loss, ref, rtol=1e-3, atol=1e-3), (loss, ref)

    # bf16 feature path: halves the dominant HBM stream, MXU-native on all gens.
    loss_bf16 = jax.block_until_ready(
        jax.jit(contrast_loss)(fea_middle.astype(jnp.bfloat16), pred, gt, mask))
    assert bool(jnp.isfinite(loss_bf16)), loss_bf16
    assert jnp.allclose(loss_bf16, ref, atol=5e-2), (loss_bf16, ref)

    print("KERNEL_OK")
</pallas_src>

<mosaic_0001>
module attributes {stable_mosaic.version = 11 : i64} {
  func.func @_stats_kernel(%arg0: i32, %arg1: i32, %arg2: i32, %arg3: memref<1x1x128xf32, #tpu.memory_space<vmem>>, %arg4: memref<1x1x128xf32, #tpu.memory_space<vmem>>, %arg5: memref<1x1x128xf32, #tpu.memory_space<vmem>>, %arg6: memref<1x32x128xf32, #tpu.memory_space<vmem>>, %arg7: memref<1x1x32xf32, #tpu.memory_space<vmem>>, %arg8: memref<1x1x1xf32, #tpu.memory_space<vmem>>, %arg9: memref<1x1x1xf32, #tpu.memory_space<vmem>>, %arg10: memref<1x1x128xf32, #tpu.memory_space<vmem>>) attributes {dimension_semantics = [#tpu.dimension_semantics<parallel>, #tpu.dimension_semantics<parallel>, #tpu.dimension_semantics<arbitrary>], iteration_bounds = array<i64: 2, 1, 1>, scalar_prefetch = 0 : i64, scratch_operands = 0 : i64, tpu.core_type = #tpu.core_type<tc>, window_params = [{transform_indices = @transform_0, window_bounds = array<i64: 1, 1, 128>}, {transform_indices = @transform_1, window_bounds = array<i64: 1, 1, 128>}, {transform_indices = @transform_2, window_bounds = array<i64: 1, 1, 128>}, {transform_indices = @transform_3, window_bounds = array<i64: 1, 32, 128>}, {transform_indices = @transform_4, window_bounds = array<i64: 1, 1, 32>}, {transform_indices = @transform_5, window_bounds = array<i64: 1, 1, 1>}, {transform_indices = @transform_6, window_bounds = array<i64: 1, 1, 1>}, {transform_indices = @transform_7, window_bounds = array<i64: 1, 1, 128>}]} {
    %c0_i32 = arith.constant 0 : i32
    %0 = arith.cmpi eq, %arg2, %c0_i32 : i32
    %1 = arith.extui %0 : i1 to i32
    %c0_i32_0 = arith.constant 0 : i32
    %2 = arith.cmpi ne, %1, %c0_i32_0 : i32
    scf.if %2 {
      %cst_40 = arith.constant 0.000000e+00 : f32
      %57 = vector.broadcast %cst_40 : f32 to vector<1x1x32xf32>
      %c0_41 = arith.constant 0 : index
      %c0_42 = arith.constant 0 : index
      %c0_43 = arith.constant 0 : index
      %58 = vector.load %arg7[%c0_41, %c0_42, %c0_43] : memref<1x1x32xf32, #tpu.memory_space<vmem>>, vector<1x1x32xf32>
      tpu.vector_store %arg7[%c0_41, %c0_42, %c0_43], %57 {strides = array<i32>} : memref<1x1x32xf32, #tpu.memory_space<vmem>>, vector<1x1x32xf32>,
      %cst_44 = arith.constant 0.000000e+00 : f32
      %59 = vector.broadcast %cst_44 : f32 to vector<1x1x1xf32>
      %c0_45 = arith.constant 0 : index
      %c0_46 = arith.constant 0 : index
      %c0_47 = arith.constant 0 : index
      %60 = vector.load %arg8[%c0_45, %c0_46, %c0_47] : memref<1x1x1xf32, #tpu.memory_space<vmem>>, vector<1x1x1xf32>
      tpu.vector_store %arg8[%c0_45, %c0_46, %c0_47], %59 {strides = array<i32>} : memref<1x1x1xf32, #tpu.memory_space<vmem>>, vector<1x1x1xf32>,
      %cst_48 = arith.constant 0.000000e+00 : f32
      %61 = vector.broadcast %cst_48 : f32 to vector<1x1x1xf32>
      %c0_49 = arith.constant 0 : index
      %c0_50 = arith.constant 0 : index
      %c0_51 = arith.constant 0 : index
      %62 = vector.load %arg9[%c0_49, %c0_50, %c0_51] : memref<1x1x1xf32, #tpu.memory_space<vmem>>, vector<1x1x1xf32>
      tpu.vector_store %arg9[%c0_49, %c0_50, %c0_51], %61 {strides = array<i32>} : memref<1x1x1xf32, #tpu.memory_space<vmem>>, vector<1x1x1xf32>,
    } else {
    }
    %c0 = arith.constant 0 : index
    %c0_1 = arith.constant 0 : index
    %c0_2 = arith.constant 0 : index
    %3 = vector.load %arg3[%c0, %c0_1, %c0_2] : memref<1x1x128xf32, #tpu.memory_space<vmem>>, vector<1x1x128xf32>
    %4 = vector.shape_cast %3 : vector<1x1x128xf32> to vector<1x128xf32>
    %c0_3 = arith.constant 0 : index
    %c0_4 = arith.constant 0 : index
    %c0_5 = arith.constant 0 : index
    %5 = vector.load %arg4[%c0_3, %c0_4, %c0_5] : memref<1x1x128xf32, #tpu.memory_space<vmem>>, vector<1x1x128xf32>
    %6 = vector.shape_cast %5 : vector<1x1x128xf32> to vector<1x128xf32>
    %c0_6 = arith.constant 0 : index
    %c0_7 = arith.constant 0 : index
    %c0_8 = arith.constant 0 : index
    %7 = vector.load %arg5[%c0_6, %c0_7, %c0_8] : memref<1x1x128xf32, #tpu.memory_space<vmem>>, vector<1x1x128xf32>
    %8 = vector.shape_cast %7 : vector<1x1x128xf32> to vector<1x128xf32>
    %9 = arith.mulf %4, %8 : vector<1x128xf32>
    %cst = arith.constant 1.000000e+00 : f32
    %10 = vector.broadcast %cst : f32 to vector<1x128xf32>
    %11 = arith.subf %10, %4 : vector<1x128xf32>
    %12 = arith.mulf %11, %8 : vector<1x128xf32>
    %13 = arith.mulf %12, %6 : vector<1x128xf32>
    %cst_9 = arith.constant 1.000000e+00 : f32
    %14 = vector.broadcast %cst_9 : f32 to vector<1x128xf32>
    %15 = arith.cmpf oeq, %9, %14 : vector<1x128xf32>
    %16 = arith.extui %15 : vector<1x128xi1> to vector<1x128xi32>
    %17 = arith.sitofp %16 : vector<1x128xi32> to vector<1x128xf32>
    %cst_10 = arith.constant 2.000000e-01 : f32
    %18 = vector.broadcast %cst_10 : f32 to vector<1x128xf32>
    %19 = arith.cmpf oge, %13, %18 : vector<1x128xf32>
    %20 = arith.extui %19 : vector<1x128xi1> to vector<1x128xi32>
    %21 = arith.sitofp %20 : vector<1x128xi32> to vector<1x128xf32>
    %c0_11 = arith.constant 0 : index
    %c0_12 = arith.constant 0 : index
    %c0_13 = arith.constant 0 : index
    %22 = vector.load %arg6[%c0_11, %c0_12, %c0_13] : memref<1x32x128xf32, #tpu.memory_space<vmem>>, vector<1x32x128xf32>
    %23 = vector.shape_cast %22 : vector<1x32x128xf32> to vector<32x128xf32>
    %c0_14 = arith.constant 0 : index
    %c0_15 = arith.constant 0 : index
    %c0_16 = arith.constant 0 : index
    %24 = vector.load %arg7[%c0_14, %c0_15, %c0_16] : memref<1x1x32xf32, #tpu.memory_space<vmem>>, vector<1x1x32xf32>
    %25 = vector.shape_cast %24 : vector<1x1x32xf32> to vector<1x32xf32>
    %cst_17 = arith.constant dense<0.000000e+00> : vector<1x32xf32>
    %26 = tpu.matmul %17, %23, %cst_17 {dimension_numbers = #tpu.dot_dimension_numbers<[1], [1], [0], [0], [0, 0, 1, 0], [], []>} : vector<1x128xf32>, vector<32x128xf32>, vector<1x32xf32> -> vector<1x32xf32>
    %27 = arith.addf %25, %26 : vector<1x32xf32>
    %c0_18 = arith.constant 0 : index
    %c0_19 = arith.constant 0 : index
    %c0_20 = arith.constant 0 : index
    %28 = vector.load %arg7[%c0_18, %c0_19, %c0_20] : memref<1x1x32xf32, #tpu.memory_space<vmem>>, vector<1x1x32xf32>
    %29 = vector.shape_cast %28 : vector<1x1x32xf32> to vector<1x32xf32>
    %30 = vector.shape_cast %27 : vector<1x32xf32> to vector<1x1x32xf32>
    tpu.vector_store %arg7[%c0_18, %c0_19, %c0_20], %30 {strides = array<i32>} : memref<1x1x32xf32, #tpu.memory_space<vmem>>, vector<1x1x32xf32>,
    %c0_21 = arith.constant 0 : index
    %c0_22 = arith.constant 0 : index
    %c0_23 = arith.constant 0 : index
    %31 = vector.load %arg8[%c0_21, %c0_22, %c0_23] : memref<1x1x1xf32, #tpu.memory_space<vmem>>, vector<1x1x1xf32>
    %32 = vector.shape_cast %31 : vector<1x1x1xf32> to vector<1x1xf32>
    %cst_24 = arith.constant dense<0.000000e+00> : vector<1xf32>
    %33 = vector.multi_reduction <add>, %17, %cst_24 [1] : vector<1x128xf32> to vector<1xf32>
    %34 = vector.shape_cast %33 : vector<1xf32> to vector<1x1xf32>
    %35 = arith.addf %32, %34 : vector<1x1xf32>
    %c0_25 = arith.constant 0 : index
    %c0_26 = arith.constant 0 : index
    %c0_27 = arith.constant 0 : index
    %36 = vector.load %arg8[%c0_25, %c0_26, %c0_27] : memref<1x1x1xf32, #tpu.memory_space<vmem>>, vector<1x1x1xf32>
    %37 = vector.shape_cast %36 : vector<1x1x1xf32> to vector<1x1xf32>
    %38 = vector.shape_cast %35 : vector<1x1xf32> to vector<1x1x1xf32>
    tpu.vector_store %arg8[%c0_25, %c0_26, %c0_27], %38 {strides = array<i32>} : memref<1x1x1xf32, #tpu.memory_space<vmem>>, vector<1x1x1xf32>,
    %c0_28 = arith.constant 0 : index
    %c0_29 = arith.constant 0 : index
    %c0_30 = arith.constant 0 : index
    %39 = vector.load %arg9[%c0_28, %c0_29, %c0_30] : memref<1x1x1xf32, #tpu.memory_space<vmem>>, vector<1x1x1xf32>
    %40 = vector.shape_cast %39 : vector<1x1x1xf32> to vector<1x1xf32>
    %cst_31 = arith.constant dense<0.000000e+00> : vector<1xf32>
    %41 = vector.multi_reduction <add>, %21, %cst_31 [1] : vector<1x128xf32> to vector<1xf32>
    %42 = vector.shape_cast %41 : vector<1xf32> to vector<1x1xf32>
    %43 = arith.addf %40, %42 : vector<1x1xf32>
    %c0_32 = arith.constant 0 : index
    %c0_33 = arith.constant 0 : index
    %c0_34 = arith.constant 0 : index
    %44 = vector.load %arg9[%c0_32, %c0_33, %c0_34] : memref<1x1x1xf32, #tpu.memory_space<vmem>>, vector<1x1x1xf32>
    %45 = vector.shape_cast %44 : vector<1x1x1xf32> to vector<1x1xf32>
    %46 = vector.shape_cast %43 : vector<1x1xf32> to vector<1x1x1xf32>
    tpu.vector_store %arg9[%c0_32, %c0_33, %c0_34], %46 {strides = array<i32>} : memref<1x1x1xf32, #tpu.memory_space<vmem>>, vector<1x1x1xf32>,
    %47 = arith.mulf %23, %23 : vector<32x128xf32>
    %cst_35 = arith.constant dense<0.000000e+00> : vector<128xf32>
    %48 = vector.multi_reduction <add>, %47, %cst_35 [0] : vector<32x128xf32> to vector<128xf32>
    %49 = vector.shape_cast %48 : vector<128xf32> to vector<1x128xf32>
    %cst_36 = arith.constant 1.000000e-16 : f32
    %50 = vector.broadcast %cst_36 : f32 to vector<1x128xf32>
    %51 = arith.maximumf %49, %50 : vector<1x128xf32>
    %52 = math.rsqrt %51 : vector<1x128xf32>
    %53 = arith.mulf %21, %52 : vector<1x128xf32>
    %c0_37 = arith.constant 0 : index
    %c0_38 = arith.constant 0 : index
    %c0_39 = arith.constant 0 : index
    %54 = vector.load %arg10[%c0_37, %c0_38, %c0_39] : memref<1x1x128xf32, #tpu.memory_space<vmem>>, vector<1x1x128xf32>
    %55 = vector.shape_cast %54 : vector<1x1x128xf32> to vector<1x128xf32>
    %56 = vector.shape_cast %53 : vector<1x128xf32> to vector<1x1x128xf32>
    tpu.vector_store %arg10[%c0_37, %c0_38, %c0_39], %56 {strides = array<i32>} : memref<1x1x128xf32, #tpu.memory_space<vmem>>, vector<1x1x128xf32>,
    return
  }
  func.func @transform_0(%arg0: i32, %arg1: i32, %arg2: i32) -> (i32, i32, i32) {
    %c1_i32 = arith.constant 1 : i32
    %0 = arith.muli %arg1, %c1_i32 : i32
    %1 = arith.addi %0, %arg2 : i32
    %c0_i32 = arith.constant 0 : i32
    %c0_i32_0 = arith.constant 0 : i32
    return %arg0, %c0_i32, %1 : i32, i32, i32
  }
  func.func @transform_1(%arg0: i32, %arg1: i32, %arg2: i32) -> (i32, i32, i32) {
    %c1_i32 = arith.constant 1 : i32
    %0 = arith.muli %arg1, %c1_i32 : i32
    %1 = arith.addi %0, %arg2 : i32
    %c0_i32 = arith.constant 0 : i32
    %c0_i32_0 = arith.constant 0 : i32
    return %arg0, %c0_i32, %1 : i32, i32, i32
  }
  func.func @transform_2(%arg0: i32, %arg1: i32, %arg2: i32) -> (i32, i32, i32) {
    %c1_i32 = arith.constant 1 : i32
    %0 = arith.muli %arg1, %c1_i32 : i32
    %1 = arith.addi %0, %arg2 : i32
    %c0_i32 = arith.constant 0 : i32
    %c0_i32_0 = arith.constant 0 : i32
    return %arg0, %c0_i32, %1 : i32, i32, i32
  }
  func.func @transform_3(%arg0: i32, %arg1: i32, %arg2: i32) -> (i32, i32, i32) {
    %c1_i32 = arith.constant 1 : i32
    %0 = arith.muli %arg1, %c1_i32 : i32
    %1 = arith.addi %0, %arg2 : i32
    %c0_i32 = arith.constant 0 : i32
    %c0_i32_0 = arith.constant 0 : i32
    return %arg0, %c0_i32, %1 : i32, i32, i32
  }
  func.func @transform_4(%arg0: i32, %arg1: i32, %arg2: i32) -> (i32, i32, i32) {
    %c1_i32 = arith.constant 1 : i32
    %0 = arith.muli %arg0, %c1_i32 : i32
    %1 = arith.addi %0, %arg1 : i32
    %c0_i32 = arith.constant 0 : i32
    %c0_i32_0 = arith.constant 0 : i32
    %c0_i32_1 = arith.constant 0 : i32
    return %1, %c0_i32, %c0_i32_0 : i32, i32, i32
  }
  func.func @transform_5(%arg0: i32, %arg1: i32, %arg2: i32) -> (i32, i32, i32) {
    %c1_i32 = arith.constant 1 : i32
    %0 = arith.muli %arg0, %c1_i32 : i32
    %1 = arith.addi %0, %arg1 : i32
    %c0_i32 = arith.constant 0 : i32
    %c0_i32_0 = arith.constant 0 : i32
    %c0_i32_1 = arith.constant 0 : i32
    return %1, %c0_i32, %c0_i32_0 : i32, i32, i32
  }
  func.func @transform_6(%arg0: i32, %arg1: i32, %arg2: i32) -> (i32, i32, i32) {
    %c1_i32 = arith.constant 1 : i32
    %0 = arith.muli %arg0, %c1_i32 : i32
    %1 = arith.addi %0, %arg1 : i32
    %c0_i32 = arith.constant 0 : i32
    %c0_i32_0 = arith.constant 0 : i32
    %c0_i32_1 = arith.constant 0 : i32
    return %1, %c0_i32, %c0_i32_0 : i32, i32, i32
  }
  func.func @transform_7(%arg0: i32, %arg1: i32, %arg2: i32) -> (i32, i32, i32) {
    %c1_i32 = arith.constant 1 : i32
    %0 = arith.muli %arg1, %c1_i32 : i32
    %1 = arith.addi %0, %arg2 : i32
    %c0_i32 = arith.constant 0 : i32
    %c0_i32_0 = arith.constant 0 : i32
    return %arg0, %c0_i32, %1 : i32, i32, i32
  }
}

module attributes {stable_mosaic.version = 11 : i64} {
  func.func @_negloss_kernel(%arg0: i32, %arg1: i32, %arg2: i32, %arg3: memref<1x32xf32, #tpu.memory_space<vmem>>, %arg4: memref<1x32x128xf32, #tpu.memory_space<vmem>>, %arg5: memref<1x1x128xf32, #tpu.memory_space<vmem>>, %arg6: memref<1x1x1xf32, #tpu.memory_space<vmem>>) attributes {dimension_semantics = [#tpu.dimension_semantics<parallel>, #tpu.dimension_semantics<parallel>, #tpu.dimension_semantics<arbitrary>], iteration_bounds = array<i64: 2, 1, 1>, scalar_prefetch = 0 : i64, scratch_operands = 0 : i64, tpu.core_type = #tpu.core_type<tc>, window_params = [{pipeline_mode = #tpu.pipeline_mode<synchronous>, transform_indices = @transform_0, window_bounds = array<i64: 1, 32>}, {transform_indices = @transform_1, window_bounds = array<i64: 1, 32, 128>}, {transform_indices = @transform_2, window_bounds = array<i64: 1, 1, 128>}, {transform_indices = @transform_3, window_bounds = array<i64: 1, 1, 1>}]} {
    %c0_i32 = arith.constant 0 : i32
    %0 = arith.cmpi eq, %arg2, %c0_i32 : i32
    %1 = arith.extui %0 : i1 to i32
    %c0_i32_0 = arith.constant 0 : i32
    %2 = arith.cmpi ne, %1, %c0_i32_0 : i32
    scf.if %2 {
      %cst_20 = arith.constant 0.000000e+00 : f32
      %29 = vector.broadcast %cst_20 : f32 to vector<1x1x1xf32>
      %c0_21 = arith.constant 0 : index
      %c0_22 = arith.constant 0 : index
      %c0_23 = arith.constant 0 : index
      %30 = vector.load %arg6[%c0_21, %c0_22, %c0_23] : memref<1x1x1xf32, #tpu.memory_space<vmem>>, vector<1x1x1xf32>
      tpu.vector_store %arg6[%c0_21, %c0_22, %c0_23], %29 {strides = array<i32>} : memref<1x1x1xf32, #tpu.memory_space<vmem>>, vector<1x1x1xf32>,
    } else {
    }
    %c0 = arith.constant 0 : index
    %c0_1 = arith.constant 0 : index
    %3 = vector.load %arg3[%c0, %c0_1] : memref<1x32xf32, #tpu.memory_space<vmem>>, vector<1x32xf32>
    %c0_2 = arith.constant 0 : index
    %c0_3 = arith.constant 0 : index
    %c0_4 = arith.constant 0 : index
    %4 = vector.load %arg4[%c0_2, %c0_3, %c0_4] : memref<1x32x128xf32, #tpu.memory_space<vmem>>, vector<1x32x128xf32>
    %5 = vector.shape_cast %4 : vector<1x32x128xf32> to vector<32x128xf32>
    %c0_5 = arith.constant 0 : index
    %c0_6 = arith.constant 0 : index
    %c0_7 = arith.constant 0 : index
    %6 = vector.load %arg5[%c0_5, %c0_6, %c0_7] : memref<1x1x128xf32, #tpu.memory_space<vmem>>, vector<1x1x128xf32>
    %7 = vector.shape_cast %6 : vector<1x1x128xf32> to vector<1x128xf32>
    %cst = arith.constant dense<0.000000e+00> : vector<1x128xf32>
    %8 = tpu.matmul %3, %5, %cst {dimension_numbers = #tpu.dot_dimension_numbers<[1], [0], [0], [1], [0, 0, 1, 1], [], []>} : vector<1x32xf32>, vector<32x128xf32>, vector<1x128xf32> -> vector<1x128xf32>
    %9 = arith.mulf %8, %7 : vector<1x128xf32>
    %cst_8 = arith.constant 5.000000e+00 : f32
    %10 = vector.broadcast %cst_8 : f32 to vector<1x128xf32>
    %11 = arith.mulf %10, %9 : vector<1x128xf32>
    %12 = math.tanh %11 : vector<1x128xf32>
    %cst_9 = arith.constant 1.000000e+00 : f32
    %13 = vector.broadcast %cst_9 : f32 to vector<1x128xf32>
    %14 = arith.addf %13, %12 : vector<1x128xf32>
    %cst_10 = arith.constant 5.000000e-01 : f32
    %15 = vector.broadcast %cst_10 : f32 to vector<1x128xf32>
    %16 = arith.mulf %15, %14 : vector<1x128xf32>
    %cst_11 = arith.constant 0.000000e+00 : f32
    %17 = vector.broadcast %cst_11 : f32 to vector<1x128xf32>
    %18 = arith.cmpf ogt, %7, %17 : vector<1x128xf32>
    %cst_12 = arith.constant 0.000000e+00 : f32
    %19 = vector.broadcast %cst_12 : f32 to vector<1x128xf32>
    %20 = arith.select %18, %16, %19 : vector<1x128xi1>, vector<1x128xf32>
    %c0_13 = arith.constant 0 : index
    %c0_14 = arith.constant 0 : index
    %c0_15 = arith.constant 0 : index
    %21 = vector.load %arg6[%c0_13, %c0_14, %c0_15] : memref<1x1x1xf32, #tpu.memory_space<vmem>>, vector<1x1x1xf32>
    %22 = vector.shape_cast %21 : vector<1x1x1xf32> to vector<1x1xf32>
    %cst_16 = arith.constant dense<0.000000e+00> : vector<1xf32>
    %23 = vector.multi_reduction <add>, %20, %cst_16 [1] : vector<1x128xf32> to vector<1xf32>
    %24 = vector.shape_cast %23 : vector<1xf32> to vector<1x1xf32>
    %25 = arith.addf %22, %24 : vector<1x1xf32>
    %c0_17 = arith.constant 0 : index
    %c0_18 = arith.constant 0 : index
    %c0_19 = arith.constant 0 : index
    %26 = vector.load %arg6[%c0_17, %c0_18, %c0_19] : memref<1x1x1xf32, #tpu.memory_space<vmem>>, vector<1x1x1xf32>
    %27 = vector.shape_cast %26 : vector<1x1x1xf32> to vector<1x1xf32>
    %28 = vector.shape_cast %25 : vector<1x1xf32> to vector<1x1x1xf32>
    tpu.vector_store %arg6[%c0_17, %c0_18, %c0_19], %28 {strides = array<i32>} : memref<1x1x1xf32, #tpu.memory_space<vmem>>, vector<1x1x1xf32>,
    return
  }
  func.func @transform_0(%arg0: i32, %arg1: i32, %arg2: i32) -> (i32, i32) {
    %c0_i32 = arith.constant 0 : i32
    %c0_i32_0 = arith.constant 0 : i32
    %c0_i32_1 = arith.constant 0 : i32
    return %c0_i32, %c0_i32_0 : i32, i32
  }
  func.func @transform_1(%arg0: i32, %arg1: i32, %arg2: i32) -> (i32, i32, i32) {
    %c1_i32 = arith.constant 1 : i32
    %0 = arith.muli %arg1, %c1_i32 : i32
    %1 = arith.addi %0, %arg2 : i32
    %c0_i32 = arith.constant 0 : i32
    %c0_i32_0 = arith.constant 0 : i32
    return %arg0, %c0_i32, %1 : i32, i32, i32
  }
  func.func @transform_2(%arg0: i32, %arg1: i32, %arg2: i32) -> (i32, i32, i32) {
    %c1_i32 = arith.constant 1 : i32
    %0 = arith.muli %arg1, %c1_i32 : i32
    %1 = arith.addi %0, %arg2 : i32
    %c0_i32 = arith.constant 0 : i32
    %c0_i32_0 = arith.constant 0 : i32
    return %arg0, %c0_i32, %1 : i32, i32, i32
  }
  func.func @transform_3(%arg0: i32, %arg1: i32, %arg2: i32) -> (i32, i32, i32) {
    %c1_i32 = arith.constant 1 : i32
    %0 = arith.muli %arg0, %c1_i32 : i32
    %1 = arith.addi %0, %arg1 : i32
    %c0_i32 = arith.constant 0 : i32
    %c0_i32_0 = arith.constant 0 : i32
    %c0_i32_1 = arith.constant 0 : i32
    return %1, %c0_i32, %c0_i32_0 : i32, i32, i32
  }
}

</mosaic_0001>

<bundles_post_ra>
// kernel: squeeze.2
= control target key start
LH: loop header
LB: loop body
LE: loop exit
PB: predicated region body
PF: predicated region fallthrough
CT: control target
= control target key end

     0   :  { %2 = vsyncpa [#allocation1], 0  ;;  %s454_s6 = smov [#allocation0]   ;;  %s599_s0 = inlined_call_operand.hbm [shape: f32[2,1,16,16], index: 0, kind: input, shape index: {}]   ;;  %s600_s1 = inlined_call_operand.vmem [shape: f32[2,4,4,4,4], index: 1, kind: output, shape index: {}]  }
   0x1   :  { %s7_s7 = sshll.u32 %s454_s6, 4  ;;  %s8_s7 = int_to_ptr.vmem [resolvable:$true] %s7_s7 }
   0x2   :  { %s440_s8 = scalar_lea.vmem %s8_s7, 512  ;;  %p445_p1 = scmp.lt.s32.totalorder %s8_s7, %s8_s7 }
   0x3   :  { %p441_p0 = scmp.ne.s32.totalorder %s8_s7, %s440_s8  ;;  %p446_p2 = scmp.lt.s32.totalorder %s440_s8, %s440_s8 }
   0x5   :  { %p447_p3 = por %p446_p2, %p445_p1 }
   0x7   :  { %p448_p4 = pnand %p447_p3, %p441_p0 }
   0x9   :  { %451 = shalt.err (!%p448_p4)
}
   0xa   :  { %10 = dma.hbm_to_vmem [thread:$0]  %s599_s0, 512, %s8_s7, [#allocation1]  }
   0xb   :  { %452 = dma.done.wait [#allocation1], 512  }
   0xc   :  { %453 = vsyncadd [#allocation1], 4294966784  ;;  %v55_v0 = vld [vmem:[#allocation0 + $0x10] sm:$0xff]   ;;  %v37_v1 = vld [vmem:[#allocation0] sm:$0xff]   ;;  %vm13_vm0 = vcmask 31744   ;;  %s455_s0 = smov 124  }
   0xd   :  { %v64_v2 = vld [vmem:[#allocation0 + $0x18] sm:$0xff]   ;;  %56 = vrot.lane.b32.xlu1 %v55_v0, %s455_s0  ;;  %38 = vrot.lane.b32.xlu0 %v37_v1, %s455_s0  ;;  %v46_v3 = vld [vmem:[#allocation0 + $0x8] sm:$0xff]   ;;  %27 = vst.msk [vmem:[#allocation2 + $0x80] ss:$8 sm:$0xf] %vm13_vm0, %v55_v0   ;;  %s456_s11 = smov 120  }
   0xe   :  { %29 = vst.msk [vmem:[#allocation2 + $0x80] ss:$8 sm:$0xf0] %vm13_vm0, %v55_v0   ;;  %14 = vst.msk [vmem:[#allocation2] ss:$8 sm:$0xf] %vm13_vm0, %v37_v1  }
   0xf   :  { %15 = vst.msk [vmem:[#allocation2] ss:$8 sm:$0xf0] %vm13_vm0, %v37_v1   ;;  %36 = vst.msk [vmem:[#allocation2 + $0xc0] ss:$8 sm:$0xf0] %vm13_vm0, %v64_v2  }
  0x10   :  { %34 = vst.msk [vmem:[#allocation2 + $0xc0] ss:$8 sm:$0xf] %vm13_vm0, %v64_v2   ;;  %20 = vst.msk [vmem:[#allocation2 + $0x40] ss:$8 sm:$0xf] %vm13_vm0, %v46_v3  }
  0x11   :  { %22 = vst.msk [vmem:[#allocation2 + $0x40] ss:$8 sm:$0xf0] %vm13_vm0, %v46_v3   ;;  %65 = vrot.lane.b32.xlu1 %v64_v2, %s455_s0  ;;  %47 = vrot.lane.b32.xlu0 %v46_v3, %s455_s0  ;;  %s457_s12 = smov 116  }
  0x15   :  { %82 = vrot.lane.b32.xlu1 %v46_v3, %s456_s11  ;;  %73 = vrot.lane.b32.xlu0 %v37_v1, %s456_s11 }
  0x19   :  { %100 = vrot.lane.b32.xlu1 %v64_v2, %s456_s11  ;;  %91 = vrot.lane.b32.xlu0 %v55_v0, %s456_s11 }
  0x1d   :  { %117 = vrot.lane.b32.xlu1 %v46_v3, %s457_s12  ;;  %108 = vrot.lane.b32.xlu0 %v37_v1, %s457_s12 }
  0x21   :  { %135 = vrot.lane.b32.xlu1 %v64_v2, %s457_s12  ;;  %126 = vrot.lane.b32.xlu0 %v55_v0, %s457_s12 }
  0x7f   :  { %v57_v4 = vpop.permute.xlu1 %56   ;;  %v39_v5 = vpop.permute.xlu0 %38  }
  0x80   :  { %60 = vst.msk [vmem:[#allocation2 + $0x81] ss:$8 sm:$0xf] %vm13_vm0, %v57_v4   ;;  %62 = vst.msk [vmem:[#allocation2 + $0x81] ss:$8 sm:$0xf0] %vm13_vm0, %v57_v4  }
  0x81   :  { %42 = vst.msk [vmem:[#allocation2 + $0x1] ss:$8 sm:$0xf] %vm13_vm0, %v39_v5   ;;  %44 = vst.msk [vmem:[#allocation2 + $0x1] ss:$8 sm:$0xf0] %vm13_vm0, %v39_v5  }
  0x83   :  { %v66_v6 = vpop.permute.xlu1 %65   ;;  %v48_v7 = vpop.permute.xlu0 %47  }
  0x84   :  { %69 = vst.msk [vmem:[#allocation2 + $0xc1] ss:$8 sm:$0xf] %vm13_vm0, %v66_v6   ;;  %71 = vst.msk [vmem:[#allocation2 + $0xc1] ss:$8 sm:$0xf0] %vm13_vm0, %v66_v6  }
  0x85   :  { %51 = vst.msk [vmem:[#allocation2 + $0x41] ss:$8 sm:$0xf] %vm13_vm0, %v48_v7   ;;  %53 = vst.msk [vmem:[#allocation2 + $0x41] ss:$8 sm:$0xf0] %vm13_vm0, %v48_v7  }
  0x87   :  { %v83_v8 = vpop.permute.xlu1 %82   ;;  %v74_v9 = vpop.permute.xlu0 %73  }
  0x88   :  { %86 = vst.msk [vmem:[#allocation2 + $0x42] ss:$8 sm:$0xf] %vm13_vm0, %v83_v8   ;;  %88 = vst.msk [vmem:[#allocation2 + $0x42] ss:$8 sm:$0xf0] %vm13_vm0, %v83_v8  }
  0x89   :  { %77 = vst.msk [vmem:[#allocation2 + $0x2] ss:$8 sm:$0xf] %vm13_vm0, %v74_v9   ;;  %79 = vst.msk [vmem:[#allocation2 + $0x2] ss:$8 sm:$0xf0] %vm13_vm0, %v74_v9  }
  0x8b   :  { %v101_v10 = vpop.permute.xlu1 %100   ;;  %v92_v11 = vpop.permute.xlu0 %91  }
  0x8c   :  { %104 = vst.msk [vmem:[#allocation2 + $0xc2] ss:$8 sm:$0xf] %vm13_vm0, %v101_v10   ;;  %106 = vst.msk [vmem:[#allocation2 + $0xc2] ss:$8 sm:$0xf0] %vm13_vm0, %v101_v10  }
  0x8d   :  { %95 = vst.msk [vmem:[#allocation2 + $0x82] ss:$8 sm:$0xf] %vm13_vm0, %v92_v11   ;;  %97 = vst.msk [vmem:[#allocation2 + $0x82] ss:$8 sm:$0xf0] %vm13_vm0, %v92_v11  }
  0x8f   :  { %v118_v12 = vpop.permute.xlu1 %117   ;;  %v109_v13 = vpop.permute.xlu0 %108  }
  0x90   :  { %121 = vst.msk [vmem:[#allocation2 + $0x43] ss:$8 sm:$0xf] %vm13_vm0, %v118_v12   ;;  %123 = vst.msk [vmem:[#allocation2 + $0x43] ss:$8 sm:$0xf0] %vm13_vm0, %v118_v12  }
  0x91   :  { %112 = vst.msk [vmem:[#allocation2 + $0x3] ss:$8 sm:$0xf] %vm13_vm0, %v109_v13   ;;  %114 = vst.msk [vmem:[#allocation2 + $0x3] ss:$8 sm:$0xf0] %vm13_vm0, %v109_v13  }
  0x93   :  { %v136_v14 = vpop.permute.xlu1 %135   ;;  %v127_v15 = vpop.permute.xlu0 %126  }
  0x94   :  { %139 = vst.msk [vmem:[#allocation2 + $0xc3] ss:$8 sm:$0xf] %vm13_vm0, %v136_v14   ;;  %141 = vst.msk [vmem:[#allocation2 + $0xc3] ss:$8 sm:$0xf0] %vm13_vm0, %v136_v14  }
  0x95   :  { %130 = vst.msk [vmem:[#allocation2 + $0x83] ss:$8 sm:$0xf] %vm13_vm0, %v127_v15   ;;  %132 = vst.msk [vmem:[#allocation2 + $0x83] ss:$8 sm:$0xf0] %vm13_vm0, %v127_v15  }
  0x97   :  { %v199_v16 = vld [vmem:[#allocation2 + $0x40] sm:$0xf]  ;;  %v206_v17 = vld [vmem:[#allocation2 + $0x48] sm:$0xf]  ;;  %v213_v18 = vld [vmem:[#allocation2 + $0x50] sm:$0xf] }
  0x98   :  { %404 = vst [vmem:[%s600_s1 + $0x20] sm:$0xf] %v199_v16  ;;  %405 = vst [vmem:[%s600_s1 + $0x24] sm:$0xf] %v206_v17  ;;  %v220_v19 = vld [vmem:[#allocation2 + $0x58] sm:$0xf] }
  0x99   :  { %406 = vst [vmem:[%s600_s1 + $0x28] sm:$0xf] %v213_v18  ;;  %v227_v20 = vld [vmem:[#allocation2 + $0x60] sm:$0xf]  ;;  %v234_v21 = vld [vmem:[#allocation2 + $0x68] sm:$0xf] }
  0x9a   :  { %407 = vst [vmem:[%s600_s1 + $0x2c] sm:$0xf] %v220_v19  ;;  %408 = vst [vmem:[%s600_s1 + $0x30] sm:$0xf] %v227_v20  ;;  %v241_v22 = vld [vmem:[#allocation2 + $0x70] sm:$0xf] }
  0x9b   :  { %409 = vst [vmem:[%s600_s1 + $0x34] sm:$0xf] %v234_v21  ;;  %v248_v23 = vld [vmem:[#allocation2 + $0x78] sm:$0xf]  ;;  %v146_v24 = vld [vmem:[#allocation2] sm:$0xf] }
  0x9c   :  { %410 = vst [vmem:[%s600_s1 + $0x38] sm:$0xf] %v241_v22  ;;  %411 = vst [vmem:[%s600_s1 + $0x3c] sm:$0xf] %v248_v23  ;;  %v151_v25 = vld [vmem:[#allocation2 + $0x8] sm:$0xf] }
  0x9d   :  { %v157_v26 = vld [vmem:[#allocation2 + $0x10] sm:$0xf]  ;;  %v164_v27 = vld [vmem:[#allocation2 + $0x18] sm:$0xf]  ;;  %149 = vst [vmem:[%s600_s1] sm:$0xf] %v146_v24 }
  0x9e   :  { %v171_v28 = vld [vmem:[#allocation2 + $0x20] sm:$0xf]  ;;  %v178_v29 = vld [vmem:[#allocation2 + $0x28] sm:$0xf]  ;;  %v185_v30 = vld [vmem:[#allocation2 + $0x30] sm:$0xf] }
  0x9f   :  { %397 = vst [vmem:[%s600_s1 + $0x4] sm:$0xf] %v151_v25  ;;  %398 = vst [vmem:[%s600_s1 + $0x8] sm:$0xf] %v157_v26  ;;  %v192_v31 = vld [vmem:[#allocation2 + $0x38] sm:$0xf] }
  0xa0   :  { %399 = vst [vmem:[%s600_s1 + $0xc] sm:$0xf] %v164_v27  ;;  %v311_v32 = vld [vmem:[#allocation2 + $0xc0] sm:$0xf]  ;;  %v318_v33 = vld [vmem:[#allocation2 + $0xc8] sm:$0xf] }
  0xa1   :  { %400 = vst [vmem:[%s600_s1 + $0x10] sm:$0xf] %v171_v28  ;;  %401 = vst [vmem:[%s600_s1 + $0x14] sm:$0xf] %v178_v29  ;;  %v325_v34 = vld [vmem:[#allocation2 + $0xd0] sm:$0xf] }
  0xa2   :  { %402 = vst [vmem:[%s600_s1 + $0x18] sm:$0xf] %v185_v30  ;;  %420 = vst [vmem:[%s600_s1 + $0x60] sm:$0xf] %v311_v32  ;;  %v332_v35 = vld [vmem:[#allocation2 + $0xd8] sm:$0xf] }
  0xa3   :  { %421 = vst [vmem:[%s600_s1 + $0x64] sm:$0xf] %v318_v33  ;;  %403 = vst [vmem:[%s600_s1 + $0x1c] sm:$0xf] %v192_v31  ;;  %v339_v36 = vld [vmem:[#allocation2 + $0xe0] sm:$0xf] }
  0xa4   :  { %422 = vst [vmem:[%s600_s1 + $0x68] sm:$0xf] %v325_v34  ;;  %423 = vst [vmem:[%s600_s1 + $0x6c] sm:$0xf] %v332_v35  ;;  %v346_v37 = vld [vmem:[#allocation2 + $0xe8] sm:$0xf] }
  0xa5   :  { %v353_v38 = vld [vmem:[#allocation2 + $0xf0] sm:$0xf]  ;;  %v360_v39 = vld [vmem:[#allocation2 + $0xf8] sm:$0xf]  ;;  %424 = vst [vmem:[%s600_s1 + $0x70] sm:$0xf] %v339_v36 }
  0xa6   :  { %v255_v40 = vld [vmem:[#allocation2 + $0x80] sm:$0xf]  ;;  %v262_v41 = vld [vmem:[#allocation2 + $0x88] sm:$0xf]  ;;  %v269_v42 = vld [vmem:[#allocation2 + $0x90] sm:$0xf] }
  0xa7   :  { %425 = vst [vmem:[%s600_s1 + $0x74] sm:$0xf] %v346_v37  ;;  %426 = vst [vmem:[%s600_s1 + $0x78] sm:$0xf] %v353_v38  ;;  %v276_v43 = vld [vmem:[#allocation2 + $0x98] sm:$0xf] }
  0xa8   :  { %427 = vst [vmem:[%s600_s1 + $0x7c] sm:$0xf] %v360_v39  ;;  %412 = vst [vmem:[%s600_s1 + $0x40] sm:$0xf] %v255_v40  ;;  %v283_v44 = vld [vmem:[#allocation2 + $0xa0] sm:$0xf] }
  0xa9   :  { %413 = vst [vmem:[%s600_s1 + $0x44] sm:$0xf] %v262_v41  ;;  %414 = vst [vmem:[%s600_s1 + $0x48] sm:$0xf] %v269_v42  ;;  %v290_v45 = vld [vmem:[#allocation2 + $0xa8] sm:$0xf] }
  0xaa   :  { %415 = vst [vmem:[%s600_s1 + $0x4c] sm:$0xf] %v276_v43  ;;  %416 = vst [vmem:[%s600_s1 + $0x50] sm:$0xf] %v283_v44  ;;  %v297_v46 = vld [vmem:[#allocation2 + $0xb0] sm:$0xf] }
  0xab   :  { %417 = vst [vmem:[%s600_s1 + $0x54] sm:$0xf] %v290_v45  ;;  %v304_v47 = vld [vmem:[#allocation2 + $0xb8] sm:$0xf]  ;;  %418 = vst [vmem:[%s600_s1 + $0x58] sm:$0xf] %v297_v46 }
  0xac   :  { %419 = vst [vmem:[%s600_s1 + $0x5c] sm:$0xf] %v304_v47 }
  0xad   :  { %366 = vsyncpa [#allocation1], 1 }

// kernel: squeeze.3
= control target key start
LH: loop header
LB: loop body
LE: loop exit
PB: predicated region body
PF: predicated region fallthrough
CT: control target
= control target key end

     0   :  { %vm3_vm0 = vcmask 31744   ;;  %s432_s12 = smov 124   ;;  %s434_s15 = smov 116   ;;  %s585_s0 = inlined_call_operand.vmem [shape: f32[2,1,16,16], index: 0, kind: input, shape index: {}]   ;;  %s586_s1 = inlined_call_operand.vmem [shape: f32[2,4,4,4,4], index: 1, kind: output, shape index: {}]  }
   0x1   :  { %v390_v0 = vld [vmem:[%s585_s0 + $0x10] sm:$0xff]   ;;  %v27_v1 = vld [vmem:[%s585_s0] sm:$0xff]   ;;  %v391_v2 = vld [vmem:[%s585_s0 + $0x18] sm:$0xff]  }
   0x2   :  { %46 = vrot.lane.b32.xlu1 %v390_v0, %s432_s12  ;;  %28 = vrot.lane.b32.xlu0 %v27_v1, %s432_s12  ;;  %v389_v3 = vld [vmem:[%s585_s0 + $0x8] sm:$0xff]   ;;  %4 = vst.msk [vmem:[#allocation0] ss:$8 sm:$0xf] %vm3_vm0, %v27_v1   ;;  %s433_s0 = smov 120  }
   0x3   :  { %5 = vst.msk [vmem:[#allocation0] ss:$8 sm:$0xf0] %vm3_vm0, %v27_v1   ;;  %24 = vst.msk [vmem:[#allocation0 + $0xc0] ss:$8 sm:$0xf] %vm3_vm0, %v391_v2  }
   0x4   :  { %26 = vst.msk [vmem:[#allocation0 + $0xc0] ss:$8 sm:$0xf0] %vm3_vm0, %v391_v2   ;;  %17 = vst.msk [vmem:[#allocation0 + $0x80] ss:$8 sm:$0xf] %vm3_vm0, %v390_v0  }
   0x5   :  { %19 = vst.msk [vmem:[#allocation0 + $0x80] ss:$8 sm:$0xf0] %vm3_vm0, %v390_v0   ;;  %12 = vst.msk [vmem:[#allocation0 + $0x40] ss:$8 sm:$0xf0] %vm3_vm0, %v389_v3  }
   0x6   :  { %10 = vst.msk [vmem:[#allocation0 + $0x40] ss:$8 sm:$0xf] %vm3_vm0, %v389_v3   ;;  %55 = vrot.lane.b32.xlu1 %v391_v2, %s432_s12  ;;  %37 = vrot.lane.b32.xlu0 %v389_v3, %s432_s12 }
   0xa   :  { %72 = vrot.lane.b32.xlu1 %v389_v3, %s433_s0  ;;  %63 = vrot.lane.b32.xlu0 %v27_v1, %s433_s0 }
   0xe   :  { %90 = vrot.lane.b32.xlu1 %v391_v2, %s433_s0  ;;  %81 = vrot.lane.b32.xlu0 %v390_v0, %s433_s0 }
  0x12   :  { %107 = vrot.lane.b32.xlu1 %v389_v3, %s434_s15  ;;  %98 = vrot.lane.b32.xlu0 %v27_v1, %s434_s15 }
  0x16   :  { %125 = vrot.lane.b32.xlu1 %v391_v2, %s434_s15  ;;  %116 = vrot.lane.b32.xlu0 %v390_v0, %s434_s15 }
  0x74   :  { %v47_v4 = vpop.permute.xlu1 %46   ;;  %v29_v5 = vpop.permute.xlu0 %28  }
  0x75   :  { %50 = vst.msk [vmem:[#allocation0 + $0x81] ss:$8 sm:$0xf] %vm3_vm0, %v47_v4   ;;  %52 = vst.msk [vmem:[#allocation0 + $0x81] ss:$8 sm:$0xf0] %vm3_vm0, %v47_v4  }
  0x76   :  { %32 = vst.msk [vmem:[#allocation0 + $0x1] ss:$8 sm:$0xf] %vm3_vm0, %v29_v5   ;;  %34 = vst.msk [vmem:[#allocation0 + $0x1] ss:$8 sm:$0xf0] %vm3_vm0, %v29_v5  }
  0x78   :  { %v56_v6 = vpop.permute.xlu1 %55   ;;  %v38_v7 = vpop.permute.xlu0 %37  }
  0x79   :  { %59 = vst.msk [vmem:[#allocation0 + $0xc1] ss:$8 sm:$0xf] %vm3_vm0, %v56_v6   ;;  %61 = vst.msk [vmem:[#allocation0 + $0xc1] ss:$8 sm:$0xf0] %vm3_vm0, %v56_v6  }
  0x7a   :  { %41 = vst.msk [vmem:[#allocation0 + $0x41] ss:$8 sm:$0xf] %vm3_vm0, %v38_v7   ;;  %43 = vst.msk [vmem:[#allocation0 + $0x41] ss:$8 sm:$0xf0] %vm3_vm0, %v38_v7  }
  0x7c   :  { %v73_v8 = vpop.permute.xlu1 %72   ;;  %v64_v9 = vpop.permute.xlu0 %63  }
  0x7d   :  { %76 = vst.msk [vmem:[#allocation0 + $0x42] ss:$8 sm:$0xf] %vm3_vm0, %v73_v8   ;;  %78 = vst.msk [vmem:[#allocation0 + $0x42] ss:$8 sm:$0xf0] %vm3_vm0, %v73_v8  }
  0x7e   :  { %67 = vst.msk [vmem:[#allocation0 + $0x2] ss:$8 sm:$0xf] %vm3_vm0, %v64_v9   ;;  %69 = vst.msk [vmem:[#allocation0 + $0x2] ss:$8 sm:$0xf0] %vm3_vm0, %v64_v9  }
  0x80   :  { %v91_v10 = vpop.permute.xlu1 %90   ;;  %v82_v11 = vpop.permute.xlu0 %81  }
  0x81   :  { %94 = vst.msk [vmem:[#allocation0 + $0xc2] ss:$8 sm:$0xf] %vm3_vm0, %v91_v10   ;;  %96 = vst.msk [vmem:[#allocation0 + $0xc2] ss:$8 sm:$0xf0] %vm3_vm0, %v91_v10  }
  0x82   :  { %85 = vst.msk [vmem:[#allocation0 + $0x82] ss:$8 sm:$0xf] %vm3_vm0, %v82_v11   ;;  %87 = vst.msk [vmem:[#allocation0 + $0x82] ss:$8 sm:$0xf0] %vm3_vm0, %v82_v11  }
  0x84   :  { %v108_v12 = vpop.permute.xlu1 %107   ;;  %v99_v13 = vpop.permute.xlu0 %98  }
  0x85   :  { %111 = vst.msk [vmem:[#allocation0 + $0x43] ss:$8 sm:$0xf] %vm3_vm0, %v108_v12   ;;  %113 = vst.msk [vmem:[#allocation0 + $0x43] ss:$8 sm:$0xf0] %vm3_vm0, %v108_v12  }
  0x86   :  { %102 = vst.msk [vmem:[#allocation0 + $0x3] ss:$8 sm:$0xf] %vm3_vm0, %v99_v13   ;;  %104 = vst.msk [vmem:[#allocation0 + $0x3] ss:$8 sm:$0xf0] %vm3_vm0, %v99_v13  }
  0x88   :  { %v126_v14 = vpop.permute.xlu1 %125   ;;  %v117_v15 = vpop.permute.xlu0 %116  }
  0x89   :  { %129 = vst.msk [vmem:[#allocation0 + $0xc3] ss:$8 sm:$0xf] %vm3_vm0, %v126_v14   ;;  %131 = vst.msk [vmem:[#allocation0 + $0xc3] ss:$8 sm:$0xf0] %vm3_vm0, %v126_v14  }
  0x8a   :  { %120 = vst.msk [vmem:[#allocation0 + $0x83] ss:$8 sm:$0xf] %vm3_vm0, %v117_v15   ;;  %122 = vst.msk [vmem:[#allocation0 + $0x83] ss:$8 sm:$0xf0] %vm3_vm0, %v117_v15  }
  0x8c   :  { %v189_v16 = vld [vmem:[#allocation0 + $0x40] sm:$0xf]  ;;  %v196_v17 = vld [vmem:[#allocation0 + $0x48] sm:$0xf]  ;;  %v203_v18 = vld [vmem:[#allocation0 + $0x50] sm:$0xf] }
  0x8d   :  { %405 = vst [vmem:[%s586_s1 + $0x20] sm:$0xf] %v189_v16  ;;  %406 = vst [vmem:[%s586_s1 + $0x24] sm:$0xf] %v196_v17  ;;  %v210_v19 = vld [vmem:[#allocation0 + $0x58] sm:$0xf] }
  0x8e   :  { %407 = vst [vmem:[%s586_s1 + $0x28] sm:$0xf] %v203_v18  ;;  %v217_v20 = vld [vmem:[#allocation0 + $0x60] sm:$0xf]  ;;  %v224_v21 = vld [vmem:[#allocation0 + $0x68] sm:$0xf] }
  0x8f   :  { %408 = vst [vmem:[%s586_s1 + $0x2c] sm:$0xf] %v210_v19  ;;  %v231_v22 = vld [vmem:[#allocation0 + $0x70] sm:$0xf]  ;;  %v238_v23 = vld [vmem:[#allocation0 + $0x78] sm:$0xf] }
  0x90   :  { %v136_v24 = vld [vmem:[#allocation0] sm:$0xf]  ;;  %409 = vst [vmem:[%s586_s1 + $0x30] sm:$0xf] %v217_v20  ;;  %410 = vst [vmem:[%s586_s1 + $0x34] sm:$0xf] %v224_v21 }
  0x91   :  { %139 = vst [vmem:[%s586_s1] sm:$0xf] %v136_v24  ;;  %v141_v25 = vld [vmem:[#allocation0 + $0x8] sm:$0xf]  ;;  %v147_v26 = vld [vmem:[#allocation0 + $0x10] sm:$0xf] }
  0x92   :  { %v154_v27 = vld [vmem:[#allocation0 + $0x18] sm:$0xf]  ;;  %411 = vst [vmem:[%s586_s1 + $0x38] sm:$0xf] %v231_v22  ;;  %412 = vst [vmem:[%s586_s1 + $0x3c] sm:$0xf] %v238_v23 }
  0x93   :  { %398 = vst [vmem:[%s586_s1 + $0x4] sm:$0xf] %v141_v25  ;;  %399 = vst [vmem:[%s586_s1 + $0x8] sm:$0xf] %v147_v26  ;;  %v161_v28 = vld [vmem:[#allocation0 + $0x20] sm:$0xf] }
  0x94   :  { %400 = vst [vmem:[%s586_s1 + $0xc] sm:$0xf] %v154_v27  ;;  %v168_v29 = vld [vmem:[#allocation0 + $0x28] sm:$0xf]  ;;  %v175_v30 = vld [vmem:[#allocation0 + $0x30] sm:$0xf] }
  0x95   :  { %401 = vst [vmem:[%s586_s1 + $0x10] sm:$0xf] %v161_v28  ;;  %402 = vst [vmem:[%s586_s1 + $0x14] sm:$0xf] %v168_v29  ;;  %v182_v31 = vld [vmem:[#allocation0 + $0x38] sm:$0xf] }
  0x96   :  { %403 = vst [vmem:[%s586_s1 + $0x18] sm:$0xf] %v175_v30  ;;  %v301_v32 = vld [vmem:[#allocation0 + $0xc0] sm:$0xf]  ;;  %v308_v33 = vld [vmem:[#allocation0 + $0xc8] sm:$0xf] }
  0x97   :  { %404 = vst [vmem:[%s586_s1 + $0x1c] sm:$0xf] %v182_v31  ;;  %421 = vst [vmem:[%s586_s1 + $0x60] sm:$0xf] %v301_v32  ;;  %v315_v34 = vld [vmem:[#allocation0 + $0xd0] sm:$0xf] }
  0x98   :  { %422 = vst [vmem:[%s586_s1 + $0x64] sm:$0xf] %v308_v33  ;;  %v322_v35 = vld [vmem:[#allocation0 + $0xd8] sm:$0xf]  ;;  %v329_v36 = vld [vmem:[#allocation0 + $0xe0] sm:$0xf] }
  0x99   :  { %423 = vst [vmem:[%s586_s1 + $0x68] sm:$0xf] %v315_v34  ;;  %424 = vst [vmem:[%s586_s1 + $0x6c] sm:$0xf] %v322_v35  ;;  %v336_v37 = vld [vmem:[#allocation0 + $0xe8] sm:$0xf] }
  0x9a   :  { %425 = vst [vmem:[%s586_s1 + $0x70] sm:$0xf] %v329_v36  ;;  %v343_v38 = vld [vmem:[#allocation0 + $0xf0] sm:$0xf]  ;;  %v350_v39 = vld [vmem:[#allocation0 + $0xf8] sm:$0xf] }
  0x9b   :  { %426 = vst [vmem:[%s586_s1 + $0x74] sm:$0xf] %v336_v37  ;;  %427 = vst [vmem:[%s586_s1 + $0x78] sm:$0xf] %v343_v38  ;;  %v245_v40 = vld [vmem:[#allocation0 + $0x80] sm:$0xf] }
  0x9c   :  { %428 = vst [vmem:[%s586_s1 + $0x7c] sm:$0xf] %v350_v39  ;;  %v252_v41 = vld [vmem:[#allocation0 + $0x88] sm:$0xf]  ;;  %v259_v42 = vld [vmem:[#allocation0 + $0x90] sm:$0xf] }
  0x9d   :  { %413 = vst [vmem:[%s586_s1 + $0x40] sm:$0xf] %v245_v40  ;;  %414 = vst [vmem:[%s586_s1 + $0x44] sm:$0xf] %v252_v41  ;;  %v266_v43 = vld [vmem:[#allocation0 + $0x98] sm:$0xf] }
  0x9e   :  { %415 = vst [vmem:[%s586_s1 + $0x48] sm:$0xf] %v259_v42  ;;  %v273_v44 = vld [vmem:[#allocation0 + $0xa0] sm:$0xf]  ;;  %v280_v45 = vld [vmem:[#allocation0 + $0xa8] sm:$0xf] }
  0x9f   :  { %416 = vst [vmem:[%s586_s1 + $0x4c] sm:$0xf] %v266_v43  ;;  %417 = vst [vmem:[%s586_s1 + $0x50] sm:$0xf] %v273_v44  ;;  %v287_v46 = vld [vmem:[#allocation0 + $0xb0] sm:$0xf] }
  0xa0   :  { %418 = vst [vmem:[%s586_s1 + $0x54] sm:$0xf] %v280_v45  ;;  %v294_v47 = vld [vmem:[#allocation0 + $0xb8] sm:$0xf]  ;;  %419 = vst [vmem:[%s586_s1 + $0x58] sm:$0xf] %v287_v46 }
  0xa1   :  { %420 = vst [vmem:[%s586_s1 + $0x5c] sm:$0xf] %v294_v47 }

// kernel: contrast_loss.3
= control target key start
LH: loop header
LB: loop body
LE: loop exit
PB: predicated region body
PF: predicated region fallthrough
CT: control target
= control target key end

     0   :  { %s523_s12 = smov 0   ;;  %s525_s13 = smov 0   ;;  %s564_s0 = inlined_call_operand.vmem [shape: f32[1,32], index: 0, kind: input, shape index: {}]   ;;  %s565_s1 = inlined_call_operand.vmem [shape: f32[2,32,128], index: 1, kind: input, shape index: {}]   ;;  %s566_s2 = inlined_call_operand.vmem [shape: f32[2,1,128], index: 2, kind: input, shape index: {}]   ;;  %s567_s3 = inlined_call_operand.vmem [shape: f32[2,1,1], index: 3, kind: output, shape index: {}]  }
   0x1   :  { %s527_s14 = smov 0  }
   0x2 LB: > { %s32_s15 = sadd.s32 1, %s495_s13  ;;  %p426_p0 = scmp.ge.s32.totalorder %s499_s14, 1  ;;  %s499_s14 = sphi %s527_s14, %s13_s14   ;;  %s495_s13 = sphi %s525_s13, %s569_s13   ;;  %s491_s12 = sphi %s523_s12, %s568_s12  }
   0x3   : > { %p34_p1 = scmp.ge.s32.totalorder %s32_s15, 2  ;;  %p184_p2 = scmp.lt.s32.totalorder %s499_s14, 3 }
   0x5   : > { %s571_s15 = smov (%p34_p1, %s32_s15), 0  ;;  %p185_p3 = pnand %p426_p0, %p184_p2 }
   0x6   : > { %p219_p4 = scmp.lt.s32.totalorder (!%p185_p3), %s491_s12, 1 }
   0x7   : > { %188 = sbr.rel (%p185_p3) target bundleno = 381 (0x17d), region = 32 }
   0xc   : > { %v501_v0 = vmov 0.0   ;;  %vm502_vm0 = vmmov 0   ;;  %s573_s12 = smov (!%p219_p4, %s491_s12), 1  ;;  %v247_v5 = vld [vmem:[%s564_s0] sm:$0x1]  ;;  %vm253_vm1 = vcmask 261120  }
   0xd   : > { %438 = vmatprep.subr.mxu0 %v501_v0  ;;  %446 = vmatprep.mubr.msk.f32.mxu0 %vm502_vm0, %v501_v0  ;;  %s432_s16 = sshll.u32 %s573_s12, 5  ;;  %s239_s24 = scalar_lea.vmem %s567_s3, %s573_s12  ;;  %vm245_vm2 = vcmask 0   ;;  %vm335_vm4 = vcmask 1040384  }
   0xe   : > { %s226_s19 = scalar_lea.vmem %s565_s1, %s432_s16  ;;  %246 = vst.msk [vmem:[%s239_s24] sm:$0x1] %vm245_vm2, %v501_v0  ;;  %s234_s27 = scalar_lea.vmem %s566_s2, %s573_s12 }
   0xf   : > { %v251_v1 = vld [vmem:[%s226_s19 + $0x18] sm:$0xff]  ;;  %v250_v2 = vld [vmem:[%s226_s19 + $0x10] sm:$0xff]  ;;  %v249_v3 = vld [vmem:[%s226_s19 + $0x8] sm:$0xff] }
  0x10   : > { %439 = vmatpush3.msra.mxu0 %v251_v1  ;;  %v248_v4 = vld [vmem:[%s226_s19] sm:$0xff] }
  0x11   : > { %440 = vmatprep.subr.mxu0 %v501_v0  ;;  %v252_v6 = vld [vmem:[%s234_s27] sm:$0x1] }
  0x12   : > { %441 = vmatpush3.msra.mxu0 %v250_v2  ;;  %vm332_vm3 = vcmp.gt.f32.partialorder %v252_v6, 0.0 }
  0x13   : > { %442 = vmatprep.subr.mxu0 %v501_v0 }
  0x14   : > { %443 = vmatpush3.msra.mxu0 %v249_v3 }
  0x15   : > { %444 = vmatprep.subr.mxu0 %v501_v0  ;;  %v334_v16 = vld [vmem:[%s239_s24] sm:$0x1] }
  0x16   : > { %445 = vmatpush3.msra.mxu0 %v248_v4 }
  0x17   : > { %447 = vmatmul.mubr.msk.f32.vlgmr.msra.gmra.mxu0 %vm253_vm1, %v247_v5 }
  0xd7   : > { %v323_v7 = vpop.f32.mrf.mxu0 }
  0xd8   : > { %v327_v8 = vmul.f32 %v323_v7, %v252_v6 }
  0xd9   : > { %v448_v9 = vpop.f32.mrf.mxu0 }
  0xda   : > { %v328_v10 = vmul.f32 5.0, %v327_v8 }
  0xdc   : > { %475 = vtanh.f32 %v328_v10 }
  0xe9   : > { %v476_v11 = vpop.eup %475 }
  0xea   : > { %v330_v12 = vadd.f32 1.0, %v476_v11 }
  0xec   : > { %v331_v13 = vmul.f32 0.5, %v330_v12 }
  0xee   : > { %v333_v14 = vsel %vm332_vm3, %v331_v13, 0.0 }
  0xef   : > { %v336_v15 = vsel %vm335_vm4, %v333_v14, 0.0 }
  0xf0   : > { %337 = vadd.xlane.f32.xlu0 %v336_v15 }
 0x179   : > { %v338_v17 = vpop.xlane.xlu0 %337 }
 0x17a   : > { %v339_v18 = vadd.f32 %v338_v17, %v334_v16 }
 0x17c   : > { %341 = vst.msk [vmem:[%s239_s24] sm:$0x1] %vm245_vm2, %v339_v18 }
 0x17d PF: > { %s13_s14 = sadd.s32 1, %s499_s14   ;;  %s568_s12 = smov %s495_s13 }
 0x17e   : > { %p10_p5 = scmp.ge.s32.totalorder %s13_s14, 4   ;;  %s569_s13 = smov %s571_s15 }
 0x180   :  { %12 = sbr.rel (!%p10_p5) target bundleno = 2 (0x2), region = 69 }

// kernel: contrast_loss.2
= control target key start
LH: loop header
LB: loop body
LE: loop exit
PB: predicated region body
PF: predicated region fallthrough
CT: control target
= control target key end

     0   :  { %s915_s24 = smov 0   ;;  %s917_s25 = smov 0   ;;  %s999_s0 = inlined_call_operand.vmem [shape: f32[2,1,128], index: 0, kind: input, shape index: {}]   ;;  %s1000_s1 = inlined_call_operand.vmem [shape: f32[2,1,128], index: 1, kind: input, shape index: {}]   ;;  %s1001_s2 = inlined_call_operand.vmem [shape: f32[2,1,128], index: 2, kind: input, shape index: {}]   ;;  %s1002_s3 = inlined_call_operand.vmem [shape: f32[2,32,128], index: 3, kind: input, shape index: {}]   ;;  %s1003_s4 = inlined_call_operand.vmem [shape: f32[2,1,32], index: 4, kind: output, shape index: {0}]   ;;  %s1004_s5 = inlined_call_operand.vmem [shape: f32[2,1,1], index: 5, kind: output, shape index: {1}]   ;;  %s1005_s6 = inlined_call_operand.vmem [shape: f32[2,1,1], index: 6, kind: output, shape index: {2}]   ;;  %s1006_s7 = inlined_call_operand.vmem [shape: f32[2,1,128], index: 7, kind: output, shape index: {3}]  }
   0x1   :  { %s919_s26 = smov 0  }
   0x2 LB: > { %s37_s27 = sadd.s32 1, %s866_s25  ;;  %p794_p0 = scmp.ge.s32.totalorder %s870_s26, 1  ;;  %s870_s26 = sphi %s919_s26, %s18_s26   ;;  %s866_s25 = sphi %s917_s25, %s1008_s25   ;;  %s862_s24 = sphi %s915_s24, %s1007_s24  }
   0x3   : > { %p39_p1 = scmp.ge.s32.totalorder %s37_s27, 2  ;;  %p333_p2 = scmp.lt.s32.totalorder %s870_s26, 3 }
   0x5   : > { %s1010_s27 = smov (%p39_p1, %s37_s27), 0  ;;  %p334_p3 = pnand %p794_p0, %p333_p2 }
   0x6   : > { %p405_p4 = scmp.lt.s32.totalorder (!%p334_p3), %s862_s24, 1 }
   0x7   : > { %337 = sbr.rel (%p334_p3) target bundleno = 227 (0xe3), region = 36 }
   0xc   : > { %v872_v0 = vmov 0.0   ;;  %vm873_vm0 = vmmov 0   ;;  %s1012_s24 = smov (!%p405_p4, %s862_s24), 1  ;;  %vm467_vm1 = vcmask 0   ;;  %vm562_vm2 = vcmask 1040384  }
   0xd   : > { %808 = vmatprep.subr.mxu0 %v872_v0  ;;  %816 = vmatprep.mubr.msk.f32.mxu0 %vm873_vm0, %v872_v0  ;;  %s802_s28 = sshll.u32 %s1012_s24, 5  ;;  %s410_s8 = scalar_lea.vmem %s999_s0, %s1012_s24  ;;  %v874_v27 = vmov 1.0   ;;  %vm465_vm5 = vcmask 253952  }
   0xe   : > { %s436_s11 = scalar_lea.vmem %s1002_s3, %s802_s28  ;;  %s426_s14 = scalar_lea.vmem %s1001_s2, %s1012_s24  ;;  %v470_v1 = vld [vmem:[%s410_s8] sm:$0x1] }
   0xf   : > { %v486_v2 = vld [vmem:[%s436_s11 + $0x18] sm:$0xff]  ;;  %v485_v3 = vld [vmem:[%s436_s11 + $0x10] sm:$0xff]  ;;  %v484_v4 = vld [vmem:[%s436_s11 + $0x8] sm:$0xff]  ;;  %v474_v5 = vsub.f32 1.0, %v470_v1  ;;  %s418_s17 = scalar_lea.vmem %s1000_s1, %s1012_s24  ;;  %s957_s20 = scalar_lea.vmem %s1004_s5, %s1012_s24 }
  0x10   : > { %809 = vmatpush3.xpose.msra.mxu0 %v486_v2  ;;  %v576_v6 = vmul.f32 %v484_v4, %v484_v4  ;;  %v483_v7 = vld [vmem:[%s436_s11] sm:$0xff]  ;;  %v577_v10 = vmul.f32 %v485_v3, %v485_v3  ;;  %468 = vst.msk [vmem:[%s957_s20] sm:$0x1] %vm467_vm1, %v872_v0  ;;  %v578_v14 = vmul.f32 %v486_v2, %v486_v2  ;;  %s441_s23 = scalar_lea.vmem %s1003_s4, %s1012_s24  ;;  %s459_s30 = scalar_lea.vmem %s1006_s7, %s1012_s24 }
  0x11   : > { %v472_v8 = vld [vmem:[%s426_s14] sm:$0x1]  ;;  %810 = vmatprep.subr.mxu0 %v872_v0  ;;  %v575_v11 = vmul.f32 %v483_v7, %v483_v7  ;;  %466 = vst.msk [vmem:[%s441_s23] sm:$0x1] %vm465_vm5, %v872_v0  ;;  %s451_s10 = scalar_lea.vmem %s1005_s6, %s1012_s24 }
  0x12   : > { %v471_v9 = vld [vmem:[%s418_s17] sm:$0x1]  ;;  %v473_v12 = vmul.f32 %v472_v8, %v470_v1  ;;  %v475_v13 = vmul.f32 %v474_v5, %v472_v8  ;;  %469 = vst.msk [vmem:[%s451_s10] sm:$0x1] %vm467_vm1, %v872_v0 }
  0x13   : > { %v579_v15 = vadd.f32 %v576_v6, %v575_v11 }
  0x14   : > { %vm477_vm3 = vcmp.eq.f32.partialorder %v473_v12, 1.0  ;;  %v476_v16 = vmul.f32 %v475_v13, %v471_v9  ;;  %811 = vmatpush3.xpose.msra.mxu0 %v485_v3 }
  0x15   : > { %v797_v17 = vsel %vm477_vm3, 1.0, %v872_v0  ;;  %812 = vmatprep.subr.mxu0 %v872_v0  ;;  %v580_v18 = vadd.f32 %v579_v15, %v577_v10 }
  0x16   : > { %v563_v19 = vsel %vm562_vm2, %v797_v17, 0.0  ;;  %vm480_vm4 = vcmp.ge.f32.partialorder %v476_v16, 0.2 }
  0x17   : > { %564 = vadd.xlane.f32.xlu0 %v563_v19  ;;  %v798_v20 = vsel %vm480_vm4, 1.0, %v872_v0  ;;  %v581_v21 = vadd.f32 %v580_v18, %v578_v14  ;;  %v561_v33 = vld [vmem:[%s957_s20] sm:$0x1] }
  0x18   : > { %v570_v22 = vsel %vm562_vm2, %v798_v20, 0.0  ;;  %813 = vmatpush3.xpose.msra.mxu0 %v484_v4  ;;  %v487_v39 = vld [vmem:[%s441_s23] sm:$0x1] }
  0x19   : > { %814 = vmatprep.subr.mxu0 %v872_v0  ;;  %v582_v23 = vrot.slane %v581_v21, 4  ;;  %v569_v36 = vld [vmem:[%s451_s10] sm:$0x1] }
  0x1b   : > { %571 = vadd.xlane.f32.xlu0 %v570_v22  ;;  %v583_v24 = vadd.f32 %v582_v23, %v581_v21 }
  0x1c   : > { %815 = vmatpush3.xpose.msra.mxu0 %v483_v7 }
  0x1d   : > { %v584_v25 = vrot.slane %v583_v24, 2 }
  0x1f   : > { %v585_v26 = vadd.f32 %v584_v25, %v583_v24  ;;  %817 = vmatmul.mubr.msk.f32.vlgmr.msra.gmra.mxu0 %vm477_vm3, %v874_v27 }
  0x21   : > { %v586_v28 = vrot.slane %v585_v26, 1 }
  0x23   : > { %v587_v29 = vadd.f32 %v586_v28, %v585_v26 }
  0x25   : > { %v588_v30 = vmax.f32 %v587_v29, 1e-16 }
  0x27   : > { %846 = vrsqrt.f32 %v588_v30 }
  0x34   : > { %v847_v31 = vpop.eup %846 }
  0x35   : > { %v590_v32 = vmul.f32 %v847_v31, %v798_v20 }
  0x37   : > { %591 = vst [vmem:[%s459_s30] sm:$0x1] %v590_v32 }
  0xa0   : > { %v565_v34 = vpop.xlane.xlu0 %564 }
  0xa1   : > { %v566_v35 = vadd.f32 %v565_v34, %v561_v33 }
  0xa3   : > { %568 = vst.msk [vmem:[%s957_s20] sm:$0x1] %vm467_vm1, %v566_v35 }
  0xa4   : > { %v572_v37 = vpop.xlane.xlu0 %571 }
  0xa5   : > { %v573_v38 = vadd.f32 %v572_v37, %v569_v36 }
  0xa7   : > { %574 = vst.msk [vmem:[%s451_s10] sm:$0x1] %vm467_vm1, %v573_v38 }
  0xdf   : > { %v554_v40 = vpop.f32.mrf.mxu0 }
  0xe0   : > { %v558_v41 = vadd.f32 %v554_v40, %v487_v39 }
  0xe1   : > { %v818_v42 = vpop.f32.mrf.mxu0 }
  0xe2   : > { %560 = vst.msk [vmem:[%s441_s23] sm:$0x1] %vm465_vm5, %v558_v41 }
  0xe3 PF: > { %s18_s26 = sadd.s32 1, %s870_s26   ;;  %s1007_s24 = smov %s866_s25 }
  0xe4   : > { %p15_p5 = scmp.ge.s32.totalorder %s18_s26, 4   ;;  %s1008_s25 = smov %s1010_s27 }
  0xe6   :  { %17 = sbr.rel (!%p15_p5) target bundleno = 2 (0x2), region = 115 }

</bundles_post_ra>
